<compile_context>
chip_gen: v7x
topology: tpu7x:2x2x1
jax: 0.10.0
libtpu: 0.0.40
codegen_flags: <defaults>
</compile_context>

<pallas_src>
import functools

import jax
import jax.numpy as jnp
from jax.experimental import pallas as pl
from jax.experimental.pallas import tpu as pltpu


# ------------------------------ helpers ------------------------------------

def _round_up(x, m):
    return (x + m - 1) // m * m


def _vmem_limit_bytes():
    """Generation-aware scoped-VMEM budget (v5e/v6e: 128 MiB phys, v7x: 64 MiB)."""
    phys = 64 << 20  # conservative fallback (v7x-sized physical VMEM)
    try:
        info = pltpu.get_tpu_info()
        phys = int(getattr(info, "vmem_capacity_bytes", phys))
    except Exception:
        pass
    return min(phys * 3 // 4, 100 << 20)


def _tiles_for(n):
    """Return (padded_n, row_tile tm, reduction_tile tk); tm and tk divide padded_n.

    Nodes are padded only to 256 (not to tk) so the dense O(N^2) adjacency never
    blows up more than ~1.5x. tk == padded_n selects the single-K-step fast path.
    """
    np_ = _round_up(max(n, 1), 256)
    if np_ <= 4096:
        tm = 128          # >= 2 row tiles so both TensorCores get work
        tk = np_          # whole reduction in one step (no K grid axis)
    else:
        tm = 512 if (np_ % 512 == 0 and np_ // 512 >= 2) else 256
        if np_ % 2048 == 0:
            tk = 2048
        elif np_ % 1024 == 0:
            tk = 1024
        elif np_ % 512 == 0:
            tk = 512
        else:
            tk = 256
    return np_, tm, tk


def _pad2(w, rows, cols):
    return jnp.pad(w, ((0, rows - w.shape[0]), (0, cols - w.shape[1])))


# ------------------------------ kernels ------------------------------------

def project_kernel(x_ref, w_ref, b_ref, p_ref, r_ref, *, hp):
    """Fused row-tiled projection: one MXU pass computes X @ [W_l | W_r];
    first hp lanes -> P (bf16), last hp lanes (+bias) -> R (f32)."""
    xw = jnp.dot(x_ref[...], w_ref[...], preferred_element_type=jnp.float32)
    p_ref[...] = xw[:, :hp].astype(p_ref.dtype)
    r_ref[...] = (xw[:, hp:] + b_ref[...]).astype(r_ref.dtype)


def aggregate_small_kernel(a_ref, p_ref, dinv_ref, r_ref, o_ref, *, apply_relu):
    """Single-K-step aggregation: out = (A01 @ P) * deg_inv + R [+ ReLU]."""
    acc = jnp.dot(a_ref[...], p_ref[...], preferred_element_type=jnp.float32)
    out = acc * dinv_ref[...] + r_ref[...]
    if apply_relu:
        out = jnp.maximum(out, 0.0)
    o_ref[...] = out.astype(o_ref.dtype)


def aggregate_kernel(a_ref, p_ref, dinv_ref, r_ref, o_ref, acc_ref, *,
                     apply_relu, tk, p_resident):
    """Tiled K-reduction: acc += A01 @ P; epilogue scales by f32 deg_inv, adds the
    root term and (optionally) ReLU. P may be a single VMEM-resident block
    (p_resident=True) sliced per K step to avoid re-streaming it per row tile."""
    k = pl.program_id(1)

    @pl.when(k == 0)
    def _():
        acc_ref[...] = jnp.zeros_like(acc_ref)

    if p_resident:
        off = pl.multiple_of(k * tk, tk)
        p = p_ref[pl.ds(off, tk), :]
    else:
        p = p_ref[...]
    acc_ref[...] += jnp.dot(a_ref[...], p, preferred_element_type=jnp.float32)

    @pl.when(k == pl.num_programs(1) - 1)
    def _():
        out = acc_ref[...] * dinv_ref[...] + r_ref[...]
        if apply_relu:
            out = jnp.maximum(out, 0.0)
        o_ref[...] = out.astype(o_ref.dtype)


# ------------------------------ layer wrapper -------------------------------

def sage_conv(a01, dinv, x, w_fused, b, *, tm, tk, apply_relu, out_dtype,
              vmem_limit):
    """One SAGEConv layer on padded, lane-dense operands.

    a01    : (Np, Np) bf16 un-normalized (count) adjacency
    dinv   : (Np, 1)  f32 inverse in-degree (mean normalization, f32 epilogue)
    x      : (Np, Fp) bf16 node features   (Fp multiple of 128)
    w_fused: (Fp, 2*Hp) bf16 = [W_l | W_r] (Hp multiple of 128)
    b      : (1, Hp)  f32
    returns (Np, Hp) out_dtype
    """
    np_, fp = x.shape
    hp = w_fused.shape[1] // 2
    odt = jnp.dtype(out_dtype).itemsize

    # --- 1) fused projection: P = X @ W_l (bf16), R = X @ W_r + b (f32) -----
    proj_cost = pl.CostEstimate(
        flops=int(2 * np_ * fp * 2 * hp),
        transcendentals=0,
        bytes_accessed=int(2 * np_ * fp + 2 * fp * 2 * hp + (2 + 4) * np_ * hp),
    )
    p, r = pl.pallas_call(
        functools.partial(project_kernel, hp=hp),
        out_shape=(jax.ShapeDtypeStruct((np_, hp), jnp.bfloat16),
                   jax.ShapeDtypeStruct((np_, hp), jnp.float32)),
        grid=(np_ // tm,),
        in_specs=[
            pl.BlockSpec((tm, fp), lambda i: (i, 0)),       # X row tile
            pl.BlockSpec((fp, 2 * hp), lambda i: (0, 0)),   # [W_l | W_r] resident
            pl.BlockSpec((1, hp), lambda i: (0, 0)),        # bias resident
        ],
        out_specs=(
            pl.BlockSpec((tm, hp), lambda i: (i, 0)),       # P
            pl.BlockSpec((tm, hp), lambda i: (i, 0)),       # R
        ),
        compiler_params=pltpu.CompilerParams(
            dimension_semantics=("parallel",),
            vmem_limit_bytes=vmem_limit,
        ),
        cost_estimate=proj_cost,
    )(x, w_fused, b)

    # --- 2) aggregation: out = (A01 @ P) * deg_inv + R ----------------------
    agg_cost = pl.CostEstimate(
        flops=int(2 * np_ * np_ * hp),
        transcendentals=0,
        bytes_accessed=int(2 * np_ * np_ + 2 * np_ * hp + 4 * np_
                           + 4 * np_ * hp + odt * np_ * hp),
    )

    if tk == np_:
        # Small-graph fast path: 1-D row grid, whole reduction in one MXU call,
        # P fully VMEM-resident, no accumulator scratch.
        return pl.pallas_call(
            functools.partial(aggregate_small_kernel, apply_relu=apply_relu),
            out_shape=jax.ShapeDtypeStruct((np_, hp), out_dtype),
            grid=(np_ // tm,),
            in_specs=[
                pl.BlockSpec((tm, np_), lambda i: (i, 0)),   # A row stripe
                pl.BlockSpec((np_, hp), lambda i: (0, 0)),   # P (resident)
                pl.BlockSpec((tm, 1), lambda i: (i, 0)),     # deg_inv
                pl.BlockSpec((tm, hp), lambda i: (i, 0)),    # R
            ],
            out_specs=pl.BlockSpec((tm, hp), lambda i: (i, 0)),
            compiler_params=pltpu.CompilerParams(
                dimension_semantics=("parallel",),
                vmem_limit_bytes=vmem_limit,
            ),
            cost_estimate=agg_cost,
        )(a01, p, dinv, r)

    # Large-graph path: 2-D (rows x K) grid with f32 VMEM accumulator.
    # Keep P VMEM-resident across the K loop when it fits (removes the per-row-tile
    # re-stream of P from HBM); otherwise stream (tk, hp) blocks.
    p_resident = 2 * (np_ * hp * 2) <= vmem_limit // 3
    if p_resident:
        p_spec = pl.BlockSpec((np_, hp), lambda i, k: (0, 0))
    else:
        p_spec = pl.BlockSpec((tk, hp), lambda i, k: (k, 0))
    kern = functools.partial(aggregate_kernel, apply_relu=apply_relu, tk=tk,
                             p_resident=p_resident)
    return pl.pallas_call(
        kern,
        out_shape=jax.ShapeDtypeStruct((np_, hp), out_dtype),
        grid=(np_ // tm, np_ // tk),
        in_specs=[
            pl.BlockSpec((tm, tk), lambda i, k: (i, k)),     # A tile (bf16 counts)
            p_spec,                                          # P (resident or streamed)
            pl.BlockSpec((tm, 1), lambda i, k: (i, 0)),      # deg_inv (resident over k)
            pl.BlockSpec((tm, hp), lambda i, k: (i, 0)),     # R (resident over k)
        ],
        out_specs=pl.BlockSpec((tm, hp), lambda i, k: (i, 0)),
        scratch_shapes=[pltpu.VMEM((tm, hp), jnp.float32)],
        compiler_params=pltpu.CompilerParams(
            dimension_semantics=("parallel", "arbitrary"),
            vmem_limit_bytes=vmem_limit,
        ),
        cost_estimate=agg_cost,
    )(a01, p, dinv, r)


# ------------------------------ graph glue ----------------------------------

def count_adjacency(edge_index, num_nodes, padded_nodes):
    """Un-normalized (count) adjacency zero-padded to (Np, Np) in bf16, plus the
    f32 inverse in-degree 1/max(deg,1) used for mean normalization in the epilogue.
    Small integer counts are exact in bf16; the f32 per-row scaling avoids the
    bf16 1/deg quantization of the previous version.

    A01[i, j] = #edges j -> i  (edge_index[0]=src, edge_index[1]=dst).
    """
    src, dst = edge_index[0], edge_index[1]
    adj = jnp.zeros((num_nodes, num_nodes), jnp.float32).at[dst, src].add(1.0)
    deg = adj.sum(axis=1, keepdims=True)
    dinv = 1.0 / jnp.maximum(deg, 1.0)
    pad = padded_nodes - num_nodes
    a01 = jnp.pad(adj, ((0, pad), (0, pad))).astype(jnp.bfloat16)
    dinv = jnp.pad(dinv, ((0, pad), (0, 0)), constant_values=1.0)
    # TODO(synk): replace the dense O(N^2) adjacency with a block-CSR path
    #             (PrefetchScalarGridSpec-driven A/P index_maps) so zero blocks are
    #             never built, DMA'd or multiplied on sparse graphs; optionally store
    #             A in fp8 on v7x / int8 on v6e to halve the dominant HBM stream.
    return a01, dinv


def graphsage_forward(x, edge_index, params, *, dropout_p=0.5, training=False,
                      tiles=None):
    """Forward matching GraphSAGE.forward: sage1 -> relu -> dropout -> sage2."""
    # F.dropout with training=False is the identity (inference semantics).
    # TODO(synk): training-mode dropout (pltpu.prng_random_bits mask) not emitted.
    del dropout_p, training

    n, f = x.shape
    hidden = params["w_l1"].shape[1]
    classes = params["w_l2"].shape[1]

    fp = _round_up(f, 128)
    hp = _round_up(hidden, 128)
    cp = _round_up(classes, 128)
    if tiles is None:
        np_, tm, tk = _tiles_for(n)
    else:                               # explicit override (testing / tuning)
        tm, tk = tiles
        np_ = _round_up(n, max(tm, tk))
    vmem_limit = _vmem_limit_bytes()

    a01, dinv = count_adjacency(edge_index, n, np_)
    xp = jnp.pad(x, ((0, np_ - n), (0, fp - f))).astype(jnp.bfloat16)

    # Layer 1: fused [W_l | W_r] bf16 weights, ReLU fused, output kept bf16 so the
    # layer-2 input stream is halved. Padded rows equal relu(b1) (harmless: padded
    # A columns are zero and outputs are sliced).
    w1 = jnp.concatenate([_pad2(params["w_l1"], fp, hp),
                          _pad2(params["w_r1"], fp, hp)], axis=1).astype(jnp.bfloat16)
    b1 = _pad2(params["b1"], 1, hp)
    h = sage_conv(a01, dinv, xp, w1, b1, tm=tm, tk=tk, apply_relu=True,
                  out_dtype=jnp.bfloat16, vmem_limit=vmem_limit)

    # Layer 2: final output in f32.
    w2 = jnp.concatenate([_pad2(params["w_l2"], hp, cp),
                          _pad2(params["w_r2"], hp, cp)], axis=1).astype(jnp.bfloat16)
    b2 = _pad2(params["b2"], 1, cp)
    out = sage_conv(a01, dinv, h, w2, b2, tm=tm, tk=tk, apply_relu=False,
                    out_dtype=jnp.float32, vmem_limit=vmem_limit)

    return out[:n, :classes]


def init_params(key, feature, hidden, classes):
    ks = jax.random.split(key, 4)

    def glorot(k, fan_in, fan_out):
        lim = (6.0 / (fan_in + fan_out)) ** 0.5
        return jax.random.uniform(k, (fan_in, fan_out), jnp.float32, -lim, lim)

    return {
        "w_l1": glorot(ks[0], feature, hidden),
        "w_r1": glorot(ks[1], feature, hidden),
        "b1": jnp.zeros((1, hidden), jnp.float32),
        "w_l2": glorot(ks[2], hidden, classes),
        "w_r2": glorot(ks[3], hidden, classes),
        "b2": jnp.zeros((1, classes), jnp.float32),
    }


def _reference(x, edge_index, params):
    """Pure-JAX f32 reference for validation."""
    n = x.shape[0]
    src, dst = edge_index[0], edge_index[1]
    adj = jnp.zeros((n, n), jnp.float32).at[dst, src].add(1.0)
    a = adj / jnp.maximum(adj.sum(axis=1, keepdims=True), 1.0)
    h = a @ x @ params["w_l1"] + x @ params["w_r1"] + params["b1"]
    h = jnp.maximum(h, 0.0)
    return a @ h @ params["w_l2"] + h @ params["w_r2"] + params["b2"]


if __name__ == "__main__":
    FEATURE, HIDDEN, CLASSES = 16, 32, 8

    key = jax.random.PRNGKey(0)
    k_params, k_g1, k_g2 = jax.random.split(key, 3)
    params = init_params(k_params, FEATURE, HIDDEN, CLASSES)

    def make_graph(k, n, num_edges):
        k_x, k_s, k_d = jax.random.split(k, 3)
        x = jax.random.normal(k_x, (n, FEATURE), jnp.float32)
        src = jax.random.randint(k_s, (num_edges,), 0, n, jnp.int32)
        dst = jax.random.randint(k_d, (num_edges,), 0, n, jnp.int32)
        return x, jnp.stack([src, dst], axis=0)   # (2, E): row0=src, row1=dst

    def check(out, ref, tag):
        err = float(jnp.max(jnp.abs(out - ref)))
        scale = 1.0 + float(jnp.max(jnp.abs(ref)))
        assert err < 5e-2 * scale, f"{tag}: max abs err {err} (scale {scale})"

    # 1) Small graph (64 nodes) -> single-K-step fast path.
    x1, ei1 = make_graph(k_g1, 64, 256)
    out1 = jax.block_until_ready(graphsage_forward(x1, ei1, params))
    assert out1.shape == (64, CLASSES), out1.shape
    check(out1, _reference(x1, ei1, params), "small-path")

    # 2) 300-node graph with forced (tm, tk)=(128, 128) -> exercises the
    #    2-D K-reduction path (accumulator + pl.when epilogue, resident P).
    x2, ei2 = make_graph(k_g2, 300, 900)
    out2 = jax.block_until_ready(
        graphsage_forward(x2, ei2, params, tiles=(128, 128)))
    assert out2.shape == (300, CLASSES), out2.shape
    check(out2, _reference(x2, ei2, params), "K-reduction path")

    print("KERNEL_OK")
</pallas_src>

<mosaic_0001>
module attributes {stable_mosaic.version = 11 : i64} {
  func.func @project_kernel(%arg0: i32, %arg1: memref<128x128xbf16, #tpu.memory_space<vmem>>, %arg2: memref<128x256xbf16, #tpu.memory_space<vmem>>, %arg3: memref<1x128xf32, #tpu.memory_space<vmem>>, %arg4: memref<128x128xbf16, #tpu.memory_space<vmem>>, %arg5: memref<128x128xf32, #tpu.memory_space<vmem>>) attributes {dimension_semantics = [#tpu.dimension_semantics<parallel>], iteration_bounds = array<i64: 2>, scalar_prefetch = 0 : i64, scratch_operands = 0 : i64, tpu.core_type = #tpu.core_type<tc>, window_params = [{transform_indices = @transform_0, window_bounds = array<i64: 128, 128>}, {pipeline_mode = #tpu.pipeline_mode<synchronous>, transform_indices = @transform_1, window_bounds = array<i64: 128, 256>}, {pipeline_mode = #tpu.pipeline_mode<synchronous>, transform_indices = @transform_2, window_bounds = array<i64: 1, 128>}, {transform_indices = @transform_3, window_bounds = array<i64: 128, 128>}, {transform_indices = @transform_4, window_bounds = array<i64: 128, 128>}]} {
    %c0 = arith.constant 0 : index
    %c0_0 = arith.constant 0 : index
    %0 = vector.load %arg1[%c0, %c0_0] : memref<128x128xbf16, #tpu.memory_space<vmem>>, vector<128x128xbf16>
    %c0_1 = arith.constant 0 : index
    %c0_2 = arith.constant 0 : index
    %1 = vector.load %arg2[%c0_1, %c0_2] : memref<128x256xbf16, #tpu.memory_space<vmem>>, vector<128x256xbf16>
    %cst = arith.constant dense<0.000000e+00> : vector<128x256xf32>
    %2 = tpu.matmul %0, %1, %cst {dimension_numbers = #tpu.dot_dimension_numbers<[1], [0], [0], [1], [0, 0, 1, 1], [], []>} : vector<128x128xbf16>, vector<128x256xbf16>, vector<128x256xf32> -> vector<128x256xf32>
    %3 = vector.extract_strided_slice %2 {offsets = [0, 0], sizes = [128, 128], strides = [1, 1]} : vector<128x256xf32> to vector<128x128xf32>
    %4 = arith.truncf %3 : vector<128x128xf32> to vector<128x128xbf16>
    %c0_3 = arith.constant 0 : index
    %c0_4 = arith.constant 0 : index
    %5 = vector.load %arg4[%c0_3, %c0_4] : memref<128x128xbf16, #tpu.memory_space<vmem>>, vector<128x128xbf16>
    tpu.vector_store %arg4[%c0_3, %c0_4], %4 {strides = array<i32>} : memref<128x128xbf16, #tpu.memory_space<vmem>>, vector<128x128xbf16>,
    %6 = vector.extract_strided_slice %2 {offsets = [0, 128], sizes = [128, 128], strides = [1, 1]} : vector<128x256xf32> to vector<128x128xf32>
    %c0_5 = arith.constant 0 : index
    %c0_6 = arith.constant 0 : index
    %7 = vector.load %arg3[%c0_5, %c0_6] : memref<1x128xf32, #tpu.memory_space<vmem>>, vector<1x128xf32>
    %8 = vector.broadcast %7 : vector<1x128xf32> to vector<128x128xf32>
    %9 = arith.addf %6, %8 : vector<128x128xf32>
    %c0_7 = arith.constant 0 : index
    %c0_8 = arith.constant 0 : index
    %10 = vector.load %arg5[%c0_7, %c0_8] : memref<128x128xf32, #tpu.memory_space<vmem>>, vector<128x128xf32>
    tpu.vector_store %arg5[%c0_7, %c0_8], %9 {strides = array<i32>} : memref<128x128xf32, #tpu.memory_space<vmem>>, vector<128x128xf32>,
    return
  }
  func.func @transform_0(%arg0: i32) -> (i32, i32) {
    %c0_i32 = arith.constant 0 : i32
    %c0_i32_0 = arith.constant 0 : i32
    return %arg0, %c0_i32 : i32, i32
  }
  func.func @transform_1(%arg0: i32) -> (i32, i32) {
    %c0_i32 = arith.constant 0 : i32
    %c0_i32_0 = arith.constant 0 : i32
    %c0_i32_1 = arith.constant 0 : i32
    return %c0_i32, %c0_i32_0 : i32, i32
  }
  func.func @transform_2(%arg0: i32) -> (i32, i32) {
    %c0_i32 = arith.constant 0 : i32
    %c0_i32_0 = arith.constant 0 : i32
    %c0_i32_1 = arith.constant 0 : i32
    return %c0_i32, %c0_i32_0 : i32, i32
  }
  func.func @transform_3(%arg0: i32) -> (i32, i32) {
    %c0_i32 = arith.constant 0 : i32
    %c0_i32_0 = arith.constant 0 : i32
    return %arg0, %c0_i32 : i32, i32
  }
  func.func @transform_4(%arg0: i32) -> (i32, i32) {
    %c0_i32 = arith.constant 0 : i32
    %c0_i32_0 = arith.constant 0 : i32
    return %arg0, %c0_i32 : i32, i32
  }
}

</mosaic_0001>

<bundles_post_ra>
// kernel: tpu_custom_call.1
= control target key start
LH: loop header
LB: loop body
LE: loop exit
PB: predicated region body
PF: predicated region fallthrough
CT: control target
= control target key end

     0   :  { %10 = vsyncpa [#allocation3], 0  ;;  %s1541_s0 = inlined_call_operand.hbm [shape: bf16[256,128], index: 0, kind: input, shape index: {}]   ;;  %s1542_s1 = inlined_call_operand.hbm [shape: bf16[128,256], index: 1, kind: input, shape index: {}]   ;;  %s1543_s2 = inlined_call_operand.vmem [shape: f32[1,128], index: 2, kind: input, shape index: {}]   ;;  %s1544_s3 = inlined_call_operand.hbm [shape: bf16[256,128], index: 3, kind: output, shape index: {0}]   ;;  %s1545_s4 = inlined_call_operand.hbm [shape: f32[256,128], index: 4, kind: output, shape index: {1}]  }
   0x1   :  { %12 = vsyncpa [#allocation3 + $0x1], 0 }
   0x2   :  { %13 = vsyncpa [#allocation6], 0 }
   0x3   :  { %14 = vsyncpa [#allocation4], 0 }
   0x4   :  { %16 = vsyncpa [#allocation4 + $0x1], 0 }
   0x5   :  { %17 = vsyncpa [#allocation9], 0 }
   0x6   :  { %19 = vsyncpa [#allocation9 + $0x1], 0  ;;  %s1234_s15 = smov 0   ;;  %s1236_s16 = smov 0  }
   0x7   :  { %s1238_s17 = smov 0   ;;  %s1240_s18 = smov 0  }
   0x8 LB: > { %s1255_s19 = sadd.s32 4294967295, %s1194_s18   ;;  %s788_s20 = sadd.s32 4294967294, %s1194_s18   ;;  %s1194_s18 = sphi %s1240_s18, %s1565_s18   ;;  %s1190_s17 = sphi %s1238_s17, %s1564_s17   ;;  %s1186_s16 = sphi %s1236_s16, %s1563_s16   ;;  %s1182_s15 = sphi %s1234_s15, %s1562_s15  }
   0x9   : > { %p45_p0 = scmp.ne.s32.totalorder %s1186_s16, %s1182_s15  ;;  %p1546_p1 = scmp.eq.s32.totalorder %s1255_s19, 0 }
   0xa   : > { %p117_p3 = scmp.eq.s32.totalorder %s788_s20, 1  ;;  %p789_p5 = scmp.ge.s32.totalorder %s1194_s18, 1 }
   0xb   : > { %p1264_p4 = por %p1546_p1, %p45_p0  ;;  %p150_p7 = scmp.lt.s32.totalorder %s1194_s18, 3 }
   0xc   : > { %p1269_p6 = por %p117_p3, %p45_p0  ;;  %s1196_s24 = smov [#allocation5]  }
   0xd   : > { %s1549_s21 = scalar_select %p1264_p4, 1, 0 }
   0xe   : > { %s1550_s22 = scalar_select %p1269_p6, 1, 0 }
   0xf   : > { %p1274_p8 = pnand %p789_p5, %p150_p7  ;;  %s162_s25 = sshll.u32 %s1196_s24, 4  ;;  %s1278_s25 = int_to_ptr.vmem [resolvable:$true] %s162_s25 }
  0x10   : > { %s1290_s27 = sadd.s32 1, %s1194_s18   ;;  %s32_s28 = sadd.s32 1, %s1190_s17 }
  0x11   : > { %s1551_s23 = scalar_select %p1274_p8, 1, 0 }
  0x12   : > { %p941_p9 = pneg %p1274_p8  ;;  %s29_s29 = ssub.s32 %s1194_s18, %s1290_s27 }
  0x13   : > { %s1034_s6 = scalar_lea.hbm %s1542_s1, 2048 }
  0x14   : > { %p1285_p11 = pnand %p941_p9, %p1546_p1  ;;  %p1035_p12 = scmp.ne.s32.totalorder %s1542_s1, %s1034_s6 }
  0x15   : > { %p1041_p5 = scmp.lt.u32.totalorder %s1034_s6, %s1542_s1 }
  0x16   : > { %p1036_p13 = pneg %p1285_p11 }
  0x18   : > { %p1037_p0 = pnand %p1036_p13, %p1035_p12 }
  0x1a   : > { %p1038_p3 = pneg %p1037_p0 }
  0x1c   : > { %p1043_p7 = pnand %p1041_p5, %p1038_p3 }
  0x1e   : > { %1046 = shalt.err (!%p1043_p7)
}
  0x1f   : > { %s1047_s11 = scalar_lea.vmem %s1278_s25, 2048  ;;  %p1055_p2 = scmp.lt.s32.totalorder %s1278_s25, %s1278_s25 }
  0x20   : > { %p1048_p9 = scmp.ne.s32.totalorder %s1278_s25, %s1047_s11  ;;  %p1056_p6 = scmp.lt.s32.totalorder %s1047_s11, %s1047_s11 }
  0x22   : > { %p1050_p10 = pnand %p1048_p9, %p1036_p13  ;;  %p1057_p4 = por %p1056_p6, %p1055_p2 }
  0x24   : > { %p1051_p1 = pneg %p1050_p10 }
  0x26   : > { %p1058_p8 = pnand %p1057_p4, %p1051_p1 }
  0x28   : > { %1061 = shalt.err (!%p1058_p8)
}
  0x29   : > { %s1197_s12 = smov 128   ;;  %s1198_s13 = smov 8  }
  0x2a   : > { %944 = dma.hbm_to_vmem [thread:$0]  (!%p1285_p11), %s1542_s1, 2048, %s1278_s25, [#allocation6], %s1197_s12, %s1197_s12, %s1198_s13  }
  0x2b   : > { %p30_p2 = scmp.eq.s32.totalorder %s29_s29, 0  ;;  %p39_p1 = scmp.ne.s32.totalorder %s1190_s17, %s1186_s16 }
  0x2c   : > { %p40_p4 = scmp.eq.s32.totalorder %s1194_s18, 0  ;;  %p957_p6 = scmp.lt.s32.totalorder %s1194_s18, 2 }
  0x2d   : > { %s1321_s24 = scalar_select %p30_p2, %s1190_s17, %s32_s28  }
  0x2e   : > { %p41_p8 = por %p40_p4, %p39_p1  ;;  %p1553_p10 = scmp.eq.s32.totalorder %s1255_s19, 1 }
  0x2f   : > { %s179_s5 = sand.u32 1, %s1190_s17   ;;  %s849_s6 = sshll.u32 %s1194_s18, 10 }
  0x30   : > { %p1325_p12 = por %p1553_p10, %p39_p1  ;;  %s792_s7 = sshll.u32 %s179_s5, 6 }
  0x31   : > { %s1334_s9 = scalar_lea.hbm %s1541_s0, %s849_s6  ;;  %s183_s25 = scalar_lea.vmem [#allocation2], %s792_s7 }
  0x32   : > { %s190_s28 = sshll.u32 %s183_s25, 4  ;;  %p1336_p11 = pnand %p957_p6, %p41_p8  ;;  %s1340_s28 = int_to_ptr.vmem [resolvable:$true] %s190_s28 }
  0x33   : > { %s1342_s10 = scalar_lea.sflag [#allocation3], %s179_s5  ;;  %s1062_s11 = scalar_lea.hbm %s1334_s9, 1024 }
  0x34   : > { %p1063_p13 = scmp.ne.s32.totalorder %s1334_s9, %s1062_s11  ;;  %p1064_p0 = pneg %p1336_p11 }
  0x35   : > { %s1067_s14 = scalar_lea.hbm %s1541_s0, 2048  ;;  %p1068_p7 = scmp.lt.u32.totalorder %s1334_s9, %s1541_s0 }
  0x36   : > { %p1065_p3 = pnand %p1064_p0, %p1063_p13  ;;  %p1069_p9 = scmp.lt.u32.totalorder %s1067_s14, %s1062_s11 }
  0x37   : > { %p1071_p1 = scmp.lt.u32.totalorder %s1062_s11, %s1334_s9 }
  0x38   : > { %p1066_p5 = pneg %p1065_p3  ;;  %p1070_p2 = por %p1069_p9, %p1068_p7 }
  0x3a   : > { %p1072_p4 = por %p1071_p1, %p1070_p2 }
  0x3c   : > { %p1073_p6 = pnand %p1072_p4, %p1066_p5 }
  0x3e   : > { %1076 = shalt.err (!%p1073_p6)
}
  0x3f   : > { %s1077_s5 = scalar_lea.vmem %s1340_s28, 1024  ;;  %s1199_s7 = smov [#allocation2]  }
  0x40   : > { %p1078_p8 = scmp.ne.s32.totalorder %s1340_s28, %s1077_s5  ;;  %s1082_s26 = sshll.u32 %s1199_s7, 4  ;;  %s1083_s26 = int_to_ptr.vmem [resolvable:$false] %s1082_s26 }
  0x41   : > { %s1084_s8 = scalar_lea.vmem %s1083_s26, 2048  ;;  %p1085_p3 = scmp.lt.s32.totalorder %s1340_s28, %s1083_s26 }
  0x42   : > { %p1080_p10 = pnand %p1078_p8, %p1064_p0  ;;  %p1086_p7 = scmp.lt.s32.totalorder %s1084_s8, %s1077_s5 }
  0x44   : > { %p1081_p13 = pneg %p1080_p10  ;;  %p1087_p9 = por %p1086_p7, %p1085_p3 }
  0x46   : > { %p1088_p2 = pnand %p1087_p9, %p1081_p13 }
  0x48   : > { %1091 = shalt.err (!%p1088_p2)
}
  0x49   : > { %s1200_s25 = smov 64   ;;  %s1201_s11 = smov 4  }
  0x4a   : > { %948 = dma.hbm_to_vmem [thread:$0]  (!%p1336_p11), %s1334_s9, 1024, %s1340_s28, %s1342_s10, %s1200_s25, %s1200_s25, %s1201_s11  }
  0x4b   : > { %p1556_p0 = scmp.ne.s32.totalorder %s1551_s23, 0 }
  0x4c   : > { %s1373_s12 = sand.u32 (!%p1556_p0), 1, %s1186_s16   ;;  %p1557_p5 = scmp.ne.s32.totalorder (!%p1556_p0), %s1549_s21, 0 }
  0x4d   : > { %202 = sbr.rel (%p1556_p0) target bundleno = 402 (0x192), region = 32  ;;  %s796_s13 = sshll.u32 (!%p1556_p0), %s1373_s12, 6 }
  0x4e   : > { %s205_s14 = scalar_lea.sflag (!%p1556_p0), [#allocation3], %s1373_s12  ;;  %s1379_s20 = scalar_lea.vmem (!%p1556_p0), [#allocation2], %s796_s13 }
  0x54   : > { %1165 = dma.done.wait (%p1557_p5), %s205_s14, 1024  }
  0x55   : > { %1167 = vsyncadd (%p1557_p5), %s205_s14, 4294966272  ;;  %p1558_p11 = scmp.eq.s32.totalorder %s1255_s19, 0 }
  0x57   : > { %1169 = dma.done.wait (%p1558_p11), [#allocation6], 2048   ;;  %p1559_p1 = pmov %p1558_p11 }
  0x58   : > { %v1202_v0 = vmov 0   ;;  %v1002_v1 = vld [vmem:[#allocation5 + $0x4] ss:$8 sps:$4 sm:$0xff]   ;;  %v1004_v2 = vld [vmem:[#allocation5] ss:$8 sps:$4 sm:$0xff]   ;;  %v1030_v21 = vld [vmem:[%s1379_s20 + $0x10] sm:$0xff]  }
  0x59   : > { %1171 = vsyncadd (%p1559_p1), [#allocation6], 4294965248  ;;  %438 = vmatprep.mubr.bf16.mxu0 %v1202_v0  ;;  %478 = vmatprep.mubr.bf16.mxu1 %v1202_v0  ;;  %v1005_v3 = vld [vmem:[#allocation5 + $0x14] ss:$8 sps:$4 sm:$0xff]   ;;  %v1007_v4 = vld [vmem:[#allocation5 + $0x10] ss:$8 sps:$4 sm:$0xff]  }
  0x5a   : > { %406 = vmatprep.subr.bf16.mxu0 %v1002_v1  ;;  %915 = vmatprep.subr.bf16.mxu1 %v1002_v1  ;;  %v1008_v5 = vld [vmem:[#allocation5 + $0x24] ss:$8 sps:$4 sm:$0xff]   ;;  %v1010_v6 = vld [vmem:[#allocation5 + $0x20] ss:$8 sps:$4 sm:$0xff]   ;;  %v1011_v7 = vld [vmem:[#allocation5 + $0x34] ss:$8 sps:$4 sm:$0xff]  }
  0x5b   : > { %407 = vmatpush1.bf16.msra.mxu0 %v1004_v2  ;;  %923 = vmatpush1.bf16.msra.mxu1 %v1004_v2  ;;  %v1013_v8 = vld [vmem:[#allocation5 + $0x30] ss:$8 sps:$4 sm:$0xff]   ;;  %v1014_v9 = vld [vmem:[#allocation5 + $0x44] ss:$8 sps:$4 sm:$0xff]   ;;  %v1016_v10 = vld [vmem:[#allocation5 + $0x40] ss:$8 sps:$4 sm:$0xff]  }
  0x5c   : > { %408 = vmatprep.subr.bf16.mxu0 %v1005_v3  ;;  %916 = vmatprep.subr.bf16.mxu1 %v1005_v3  ;;  %v1017_v11 = vld [vmem:[#allocation5 + $0x54] ss:$8 sps:$4 sm:$0xff]   ;;  %v1019_v12 = vld [vmem:[#allocation5 + $0x50] ss:$8 sps:$4 sm:$0xff]   ;;  %v1020_v13 = vld [vmem:[#allocation5 + $0x64] ss:$8 sps:$4 sm:$0xff]  }
  0x5d   : > { %v1022_v14 = vld [vmem:[#allocation5 + $0x60] ss:$8 sps:$4 sm:$0xff]   ;;  %v1023_v15 = vld [vmem:[#allocation5 + $0x74] ss:$8 sps:$4 sm:$0xff]   ;;  %v1025_v16 = vld [vmem:[#allocation5 + $0x70] ss:$8 sps:$4 sm:$0xff]  }
  0x5e   : > { %v1026_v17 = vld [vmem:[%s1379_s20] sm:$0xff]   ;;  %v1028_v19 = vld [vmem:[%s1379_s20 + $0x8] sm:$0xff]   ;;  %v1031_v22 = vld [vmem:[%s1379_s20 + $0x30] sm:$0xff]   ;;  %s799_s21 = sshll.u32 %s1373_s12, 7  ;;  %s1421_s29 = scalar_lea.vmem [#allocation7], %s796_s13 }
  0x5f   : > { %409 = vmatpush1.bf16.msra.mxu0 %v1007_v4  ;;  %924 = vmatpush1.bf16.msra.mxu1 %v1007_v4  ;;  %v1027_v18 = vld [vmem:[%s1379_s20 + $0x20] sm:$0xff]   ;;  %v1029_v20 = vld [vmem:[%s1379_s20 + $0x28] sm:$0xff]   ;;  %v1032_v23 = vld [vmem:[%s1379_s20 + $0x18] sm:$0xff]   ;;  %s1413_s28 = scalar_lea.vmem [#allocation8], %s799_s21  ;;  %s657_s10 = sshll.u32 %s1421_s29, 4  ;;  %s1449_s10 = int_to_ptr.vmem [resolvable:$true] %s657_s10 }
  0x60   : > { %410 = vmatprep.subr.bf16.mxu0 %v1008_v5  ;;  %917 = vmatprep.subr.bf16.mxu1 %v1008_v5  ;;  %v1033_v24 = vld [vmem:[%s1379_s20 + $0x38] sm:$0xff]   ;;  %v1409_v25 = vld [vmem:[%s1543_s2] ss:$0 sm:$0xff]  ;;  %s866_s6 = sshll.u32 %s1255_s19, 10  ;;  %s867_s5 = sshll.u32 %s1255_s19, 11 }
  0x61   : > { %s1455_s8 = scalar_lea.hbm %s1544_s3, %s866_s6  ;;  %s673_s25 = sshll.u32 %s1413_s28, 4  ;;  %s1469_s25 = int_to_ptr.vmem [resolvable:$true] %s673_s25 }
  0x62   : > { %s1463_s13 = scalar_lea.hbm %s1545_s4, %s867_s5  ;;  %s639_s14 = scalar_lea.sflag [#allocation4], %s1373_s12 }
  0x63   : > { %411 = vmatpush1.bf16.msra.mxu0 %v1010_v6  ;;  %925 = vmatpush1.bf16.msra.mxu1 %v1010_v6  ;;  %s1092_s20 = scalar_lea.vmem %s1449_s10, 1024  ;;  %s1203_s21 = smov [#allocation7]  }
  0x64   : > { %412 = vmatprep.subr.bf16.mxu0 %v1011_v7  ;;  %918 = vmatprep.subr.bf16.mxu1 %v1011_v7  ;;  %p1093_p4 = scmp.ne.s32.totalorder %s1449_s10, %s1092_s20  ;;  %s1096_s23 = sshll.u32 %s1203_s21, 4  ;;  %s1097_s23 = int_to_ptr.vmem [resolvable:$false] %s1096_s23 }
  0x65   : > { %s1098_s9 = scalar_lea.vmem %s1097_s23, 2048  ;;  %p1099_p10 = scmp.lt.s32.totalorder %s1449_s10, %s1097_s23 }
  0x66   : > { %p1094_p6 = pnand %p1093_p4, %p1325_p12  ;;  %p1100_p13 = scmp.lt.s32.totalorder %s1098_s9, %s1092_s20 }
  0x67   : > { %413 = vmatpush1.bf16.msra.mxu0 %v1013_v8  ;;  %926 = vmatpush1.bf16.msra.mxu1 %v1013_v8 }
  0x68   : > { %414 = vmatprep.subr.bf16.mxu0 %v1014_v9  ;;  %919 = vmatprep.subr.bf16.mxu1 %v1014_v9  ;;  %p1095_p8 = pneg %p1094_p6  ;;  %p1101_p3 = por %p1100_p13, %p1099_p10 }
  0x6a   : > { %p1102_p7 = pnand %p1101_p3, %p1095_p8 }
  0x6b   : > { %415 = vmatpush1.bf16.msra.mxu0 %v1016_v10  ;;  %927 = vmatpush1.bf16.msra.mxu1 %v1016_v10 }
  0x6c   : > { %416 = vmatprep.subr.bf16.mxu0 %v1017_v11  ;;  %920 = vmatprep.subr.bf16.mxu1 %v1017_v11 }
  0x6f   : > { %417 = vmatpush1.bf16.msra.mxu0 %v1019_v12  ;;  %928 = vmatpush1.bf16.msra.mxu1 %v1019_v12 }
  0x70   : > { %418 = vmatprep.subr.bf16.mxu0 %v1020_v13  ;;  %921 = vmatprep.subr.bf16.mxu1 %v1020_v13 }
  0x73   : > { %419 = vmatpush1.bf16.msra.mxu0 %v1022_v14  ;;  %929 = vmatpush1.bf16.msra.mxu1 %v1022_v14 }
  0x74   : > { %420 = vmatprep.subr.bf16.mxu0 %v1023_v15  ;;  %922 = vmatprep.subr.bf16.mxu1 %v1023_v15 }
  0x77   : > { %421 = vmatpush1.bf16.msra.mxu0 %v1025_v16  ;;  %930 = vmatpush1.bf16.msra.mxu1 %v1025_v16 }
  0x7a   : > { %439 = vmatmul.mubr.bf16.vlgmr.msra.gmra.mrb[0].mxu0 %v1026_v17  ;;  %479 = vmatmul.mubr.bf16.vlgmr.msra.gmra.mrb[0].mxu1 %v1027_v18 }
  0x7b   : > { %448 = vmatprep.mubr.bf16.mxu0 %v1202_v0  ;;  %488 = vmatprep.mubr.bf16.mxu1 %v1202_v0 }
  0x82   : > { %449 = vmatmul.mubr.bf16.gmra.mrb[4].mxu0 %v1028_v19  ;;  %489 = vmatmul.mubr.bf16.gmra.mrb[4].mxu1 %v1029_v20 }
  0x83   : > { %458 = vmatprep.mubr.bf16.mxu0 %v1202_v0  ;;  %498 = vmatprep.mubr.bf16.mxu1 %v1202_v0 }
  0x8a   : > { %459 = vmatmul.mubr.bf16.gmra.mrb[8].mxu0 %v1030_v21  ;;  %499 = vmatmul.mubr.bf16.gmra.mrb[8].mxu1 %v1031_v22 }
  0x8b   : > { %468 = vmatprep.mubr.bf16.mxu0 %v1202_v0  ;;  %508 = vmatprep.mubr.bf16.mxu1 %v1202_v0 }
  0x92   : > { %469 = vmatmul.mubr.bf16.gmra.mrb[12].mxu0 %v1032_v23  ;;  %509 = vmatmul.mubr.bf16.gmra.mrb[12].mxu1 %v1033_v24 }
 0x14d   : > { %v440_v26 = vpop.f32.mrb[0].mxu0  ;;  %v480_v27 = vpop.f32.mrb[0].mxu1 }
 0x14e   : > { %v442_v28 = vpop.f32.mrb[1].mxu0  ;;  %v482_v29 = vpop.f32.mrb[1].mxu1 }
 0x14f   : > { %v606_v30 = vadd.f32 %v1409_v25, %v442_v28  ;;  %v614_v31 = vadd.f32 %v1409_v25, %v482_v29  ;;  %v444_v32 = vpop.f32.mrb[2].mxu0  ;;  %v484_v33 = vpop.f32.mrb[2].mxu1 }
 0x150   : > { %v871_v34 = vpack.c.bf16 %v444_v32, %v440_v26  ;;  %v891_v35 = vpack.c.bf16 %v484_v33, %v480_v27  ;;  %v446_v36 = vpop.f32.mrb[3].mxu0  ;;  %v486_v37 = vpop.f32.mrb[3].mxu1 }
 0x151   : > { %622 = vst [vmem:[%s1413_s28] sm:$0xff] %v606_v30  ;;  %630 = vst [vmem:[%s1413_s28 + $0x40] sm:$0xff] %v614_v31  ;;  %v607_v38 = vadd.f32 %v1409_v25, %v446_v36  ;;  %v615_v39 = vadd.f32 %v1409_v25, %v486_v37 }
 0x152   : > { %872 = vst [vmem:[%s1421_s29] sm:$0xff] %v871_v34   ;;  %911 = vst [vmem:[%s1421_s29 + $0x20] sm:$0xff] %v891_v35  }
 0x153   : > { %623 = vst [vmem:[%s1413_s28 + $0x8] sm:$0xff] %v607_v38  ;;  %631 = vst [vmem:[%s1413_s28 + $0x48] sm:$0xff] %v615_v39 }
 0x155   : > { %v450_v40 = vpop.f32.mrb[4].mxu0  ;;  %v490_v41 = vpop.f32.mrb[4].mxu1 }
 0x156   : > { %v452_v42 = vpop.f32.mrb[5].mxu0  ;;  %v492_v43 = vpop.f32.mrb[5].mxu1 }
 0x157   : > { %v608_v44 = vadd.f32 %v1409_v25, %v452_v42  ;;  %v616_v45 = vadd.f32 %v1409_v25, %v492_v43  ;;  %v454_v46 = vpop.f32.mrb[6].mxu0  ;;  %v494_v47 = vpop.f32.mrb[6].mxu1 }
 0x158   : > { %v876_v48 = vpack.c.bf16 %v454_v46, %v450_v40  ;;  %v896_v49 = vpack.c.bf16 %v494_v47, %v490_v41  ;;  %v456_v50 = vpop.f32.mrb[7].mxu0  ;;  %v496_v51 = vpop.f32.mrb[7].mxu1 }
 0x159   : > { %624 = vst [vmem:[%s1413_s28 + $0x10] sm:$0xff] %v608_v44  ;;  %632 = vst [vmem:[%s1413_s28 + $0x50] sm:$0xff] %v616_v45  ;;  %v609_v52 = vadd.f32 %v1409_v25, %v456_v50  ;;  %v617_v53 = vadd.f32 %v1409_v25, %v496_v51 }
 0x15a   : > { %908 = vst [vmem:[%s1421_s29 + $0x8] sm:$0xff] %v876_v48   ;;  %912 = vst [vmem:[%s1421_s29 + $0x28] sm:$0xff] %v896_v49  }
 0x15b   : > { %625 = vst [vmem:[%s1413_s28 + $0x18] sm:$0xff] %v609_v52  ;;  %633 = vst [vmem:[%s1413_s28 + $0x58] sm:$0xff] %v617_v53 }
 0x15d   : > { %v460_v54 = vpop.f32.mrb[8].mxu0  ;;  %v500_v55 = vpop.f32.mrb[8].mxu1 }
 0x15e   : > { %v462_v56 = vpop.f32.mrb[9].mxu0  ;;  %v502_v57 = vpop.f32.mrb[9].mxu1 }
 0x15f   : > { %v610_v58 = vadd.f32 %v1409_v25, %v462_v56  ;;  %v618_v59 = vadd.f32 %v1409_v25, %v502_v57  ;;  %v464_v60 = vpop.f32.mrb[10].mxu0  ;;  %v504_v61 = vpop.f32.mrb[10].mxu1 }
 0x160   : > { %v881_v62 = vpack.c.bf16 %v464_v60, %v460_v54  ;;  %v901_v63 = vpack.c.bf16 %v504_v61, %v500_v55  ;;  %v466_v0 = vpop.f32.mrb[11].mxu0  ;;  %v506_v1 = vpop.f32.mrb[11].mxu1 }
 0x161   : > { %626 = vst [vmem:[%s1413_s28 + $0x20] sm:$0xff] %v610_v58  ;;  %634 = vst [vmem:[%s1413_s28 + $0x60] sm:$0xff] %v618_v59  ;;  %v611_v2 = vadd.f32 %v1409_v25, %v466_v0  ;;  %v619_v3 = vadd.f32 %v1409_v25, %v506_v1 }
 0x162   : > { %909 = vst [vmem:[%s1421_s29 + $0x10] sm:$0xff] %v881_v62   ;;  %913 = vst [vmem:[%s1421_s29 + $0x30] sm:$0xff] %v901_v63  }
 0x163   : > { %627 = vst [vmem:[%s1413_s28 + $0x28] sm:$0xff] %v611_v2  ;;  %635 = vst [vmem:[%s1413_s28 + $0x68] sm:$0xff] %v619_v3 }
 0x165   : > { %v470_v4 = vpop.f32.mrb[12].mxu0  ;;  %v510_v5 = vpop.f32.mrb[12].mxu1 }
 0x166   : > { %v472_v6 = vpop.f32.mrb[13].mxu0  ;;  %v512_v7 = vpop.f32.mrb[13].mxu1 }
 0x167   : > { %v612_v8 = vadd.f32 %v1409_v25, %v472_v6  ;;  %v620_v9 = vadd.f32 %v1409_v25, %v512_v7  ;;  %v474_v10 = vpop.f32.mrb[14].mxu0  ;;  %v514_v11 = vpop.f32.mrb[14].mxu1 }
 0x168   : > { %v886_v12 = vpack.c.bf16 %v474_v10, %v470_v4  ;;  %v906_v13 = vpack.c.bf16 %v514_v11, %v510_v5  ;;  %v476_v14 = vpop.f32.mrb[15].mxu0  ;;  %v516_v15 = vpop.f32.mrb[15].mxu1 }
 0x169   : > { %628 = vst [vmem:[%s1413_s28 + $0x30] sm:$0xff] %v612_v8  ;;  %636 = vst [vmem:[%s1413_s28 + $0x70] sm:$0xff] %v620_v9  ;;  %v613_v16 = vadd.f32 %v1409_v25, %v476_v14  ;;  %v621_v17 = vadd.f32 %v1409_v25, %v516_v15 }
 0x16a   : > { %910 = vst [vmem:[%s1421_s29 + $0x18] sm:$0xff] %v886_v12   ;;  %914 = vst [vmem:[%s1421_s29 + $0x38] sm:$0xff] %v906_v13  }
 0x16b   : > { %629 = vst [vmem:[%s1413_s28 + $0x38] sm:$0xff] %v613_v16  ;;  %637 = vst [vmem:[%s1413_s28 + $0x78] sm:$0xff] %v621_v17 }
 0x16c   : > { %1105 = shalt.err (!%p1102_p7)
}
 0x16d   : > { %s1106_s28 = scalar_lea.hbm %s1455_s8, 1024  ;;  %s1110_s5 = scalar_lea.hbm %s1544_s3, 2048 }
 0x16e   : > { %p1107_p9 = scmp.ne.s32.totalorder %s1455_s8, %s1106_s28  ;;  %p1111_p5 = scmp.lt.u32.totalorder %s1455_s8, %s1544_s3 }
 0x16f   : > { %p1112_p11 = scmp.lt.u32.totalorder %s1110_s5, %s1106_s28  ;;  %p1114_p4 = scmp.lt.u32.totalorder %s1106_s28, %s1455_s8 }
 0x170   : > { %p1108_p2 = pnand %p1107_p9, %p1325_p12 }
 0x171   : > { %p1113_p1 = por %p1112_p11, %p1111_p5 }
 0x172   : > { %p1109_p0 = pneg %p1108_p2 }
 0x173   : > { %p1115_p6 = por %p1114_p4, %p1113_p1 }
 0x175   : > { %p1116_p8 = pnand %p1115_p6, %p1109_p0 }
 0x177   : > { %1119 = shalt.err (!%p1116_p8)
}
 0x178   : > { %s1204_s19 = smov 64   ;;  %s1205_s11 = smov 4  }
 0x179   : > { %937 = dma.vmem_to_hbm [thread:$0]  (%p1325_p12), %s1449_s10, 1024, %s1455_s8, %s639_s14, %s1204_s19, %s1204_s19, %s1205_s11  }
 0x17a   : > { %s644_s20 = scalar_lea.sflag [#allocation9], %s1373_s12  ;;  %s1120_s21 = scalar_lea.vmem %s1469_s25, 2048 }
 0x17b   : > { %p1121_p10 = scmp.ne.s32.totalorder %s1469_s25, %s1120_s21  ;;  %s1206_s23 = smov [#allocation8]  }
 0x17c   : > { %s1124_s9 = sshll.u32 %s1206_s23, 4  ;;  %s1125_s9 = int_to_ptr.vmem [resolvable:$false] %s1124_s9 }
 0x17d   : > { %p1122_p13 = pnand %p1121_p10, %p1325_p12  ;;  %s1126_s28 = scalar_lea.vmem %s1125_s9, 4096 }
 0x17e   : > { %p1127_p7 = scmp.lt.s32.totalorder %s1469_s25, %s1125_s9  ;;  %p1128_p9 = scmp.lt.s32.totalorder %s1126_s28, %s1120_s21 }
 0x17f   : > { %p1123_p3 = pneg %p1122_p13 }
 0x180   : > { %p1129_p2 = por %p1128_p9, %p1127_p7 }
 0x182   : > { %p1130_p0 = pnand %p1129_p2, %p1123_p3 }
 0x184   : > { %1133 = shalt.err (!%p1130_p0)
}
 0x185   : > { %s1134_s10 = scalar_lea.hbm %s1463_s13, 2048  ;;  %s1138_s29 = scalar_lea.hbm %s1545_s4, 4096 }
 0x186   : > { %p1135_p5 = scmp.ne.s32.totalorder %s1463_s13, %s1134_s10  ;;  %p1139_p4 = scmp.lt.u32.totalorder %s1463_s13, %s1545_s4 }
 0x187   : > { %p1140_p6 = scmp.lt.u32.totalorder %s1138_s29, %s1134_s10  ;;  %p1142_p10 = scmp.lt.u32.totalorder %s1134_s10, %s1463_s13 }
 0x188   : > { %p1136_p11 = pnand %p1135_p5, %p1325_p12 }
 0x189   : > { %p1141_p8 = por %p1140_p6, %p1139_p4 }
 0x18a   : > { %p1137_p1 = pneg %p1136_p11 }
 0x18b   : > { %p1143_p13 = por %p1142_p10, %p1141_p8 }
 0x18d   : > { %p1144_p3 = pnand %p1143_p13, %p1137_p1 }
 0x18f   : > { %1147 = shalt.err (!%p1144_p3)
}
 0x190   : > { %s1207_s7 = smov 128   ;;  %s1208_s26 = smov 8  }
 0x191   : > { %938 = dma.vmem_to_hbm [thread:$0]  (%p1325_p12), %s1469_s25, 2048, %s1463_s13, %s644_s20, %s1207_s7, %s1207_s7, %s1208_s26  }
 0x192 PF: > { %s688_s19 = sand.u32 1, %s1182_s15   ;;  %p1560_p7 = scmp.ne.s32.totalorder %s1550_s22, 0 }
 0x193   : > { %p1561_p9 = scmp.ge.s32.totalorder %s1194_s18, 2  ;;  %s689_s11 = scalar_lea.sflag [#allocation4], %s688_s19 }
 0x195   : > { %p950_p2 = pnand %p1561_p9, %p1560_p7 }
 0x197   : > { %1173 = dma.done.wait (!%p950_p2), %s689_s11, 1024  }
 0x198   : > { %1175 = vsyncadd (!%p950_p2), %s689_s11, 4294966272  ;;  %s698_s21 = scalar_lea.sflag [#allocation9], %s688_s19 }
 0x199   : > { %1177 = dma.done.wait (!%p950_p2), %s698_s21, 2048  }
 0x19a   : > { %1179 = vsyncadd (!%p950_p2), %s698_s21, 4294965248  ;;  %p22_p12 = scmp.ge.s32.totalorder %s1290_s27, 4   ;;  %s1562_s15 = smov %s1186_s16 }
 0x19b   : > { %s1563_s16 = smov %s1190_s17  ;;  %s1564_s17 = smov %s1321_s24 }
 0x19c   : > { %s1565_s18 = smov %s1290_s27  ;;  %24 = sbr.rel (!%p22_p12) target bundleno = 8 (0x8), region = 98 }
 0x1a3   :  { %703 = vsyncpa [#allocation3], 1 }
 0x1a4   :  { %705 = vsyncpa [#allocation3 + $0x1], 1 }
 0x1a5   :  { %706 = vsyncpa [#allocation6], 1 }
 0x1a6   :  { %707 = vsyncpa [#allocation4], 1 }
 0x1a7   :  { %709 = vsyncpa [#allocation4 + $0x1], 1 }
 0x1a8   :  { %710 = vsyncpa [#allocation9], 1 }
 0x1a9   :  { %712 = vsyncpa [#allocation9 + $0x1], 1 }

</bundles_post_ra>
